<compile_context>
chip_gen: v6e
topology: v6e:2x2x1
jax: 0.10.0
libtpu: 0.0.40
codegen_flags: <defaults>
</compile_context>

<pallas_src>
import math
import functools

import jax
import jax.numpy as jnp
from jax.experimental import pallas as pl
from jax.experimental.pallas import tpu as pltpu


def _round_up(x, m):
    return (x + m - 1) // m * m


# ----------------------------------------------------------------------------- kernel
def statistician_kernel(x_ref, w1_ref, w2_ref, b2_ref, o_ref, *, dense):
    # x:  (B, K_pad)      = [f_GAP | f_GVP | 1 | 0-pad]
    # w1: (K_pad, 2*dense) = [[cw_gap, gap_w], [cw_gvp, 0], [c_b, gap_b], [0, 0]...]
    # w2: (dense, N_pad)   = lin_w zero-padded to 128 output lanes
    # b2: (1, N_pad)       = lin_b, padded lanes = -1e30
    # o:  (B, N_pad)       lane-dense softmax output (real classes in [:, :classes])

    # One MXU push gives both the concat-Linear logits and the GAP 1x1-conv output,
    # biases included via the ones column in x.
    y = jnp.dot(x_ref[...], w1_ref[...], preferred_element_type=jnp.float32)
    c_logits = y[:, :dense]
    f_gap_d = y[:, dense:]
    # NOTE: f_GVP_d / f_GVP_dd are computed in the PyTorch forward but never affect
    # y_hat; they are omitted here (would be DCE'd anyway).

    # c = softmax(c_logits) over the dense axis (exact division for torch parity)
    c_m = jnp.max(c_logits, axis=-1, keepdims=True)
    c_e = jnp.exp(c_logits - c_m)
    c = c_e / jnp.sum(c_e, axis=-1, keepdims=True)

    # attention-weighted scalar per row; ALN = ((f_GAP_d.T - f_GAP_dd)/f_GAP_dd).T
    f_gap_dd = jnp.sum(c * f_gap_d, axis=-1, keepdims=True)          # (B, 1)
    aln = (f_gap_d - f_gap_dd) / f_gap_dd

    # Dropout(0.5) -> identity (eval); head Linear padded to 128 lanes.
    # Padded logits are exactly -1e30, so exp underflows to 0 and the row softmax
    # over the real `classes` lanes is unchanged.
    logits = jnp.dot(aln, w2_ref[...], preferred_element_type=jnp.float32) + b2_ref[...]
    m = jnp.max(logits, axis=-1, keepdims=True)
    e = jnp.exp(logits - m)
    o_ref[...] = e / jnp.sum(e, axis=-1, keepdims=True)


# ----------------------------------------------------------------------------- wrapper
def statistician_forward(f_gap, f_gvp, packed, *, classes):
    B, F = f_gap.shape
    assert f_gvp.shape == (B, F)
    w1, w2, b2 = packed["w1"], packed["w2"], packed["b2"]
    k_pad, two_dense = w1.shape
    dense = two_dense // 2
    n_pad = w2.shape[1]
    assert w2.shape[0] == dense and b2.shape == (1, n_pad)
    assert k_pad >= 2 * F + 1

    # Build the augmented activation slab in XLA (cheap; fused into the feed):
    # [f_GAP | f_GVP | 1 | 0-pad] so the bias row in w1 is applied by the matmul.
    ones = jnp.ones((B, 1), jnp.float32)
    zpad = jnp.zeros((B, k_pad - 2 * F - 1), jnp.float32)
    x = jnp.concatenate([f_gap.astype(jnp.float32),
                         f_gvp.astype(jnp.float32), ones, zpad], axis=1)

    # Advisory cost for XLA scheduling around this tiny custom call.
    flops = 2 * B * k_pad * two_dense + 2 * B * dense * n_pad + 8 * B * dense
    bytes_accessed = 4 * (x.size + w1.size + w2.size + b2.size + B * n_pad)
    cost = pl.CostEstimate(flops=flops,
                           transcendentals=B * (dense + n_pad),
                           bytes_accessed=bytes_accessed)

    full = lambda a: pl.BlockSpec(a.shape, lambda i: (0,) * a.ndim)

    out = pl.pallas_call(
        functools.partial(statistician_kernel, dense=dense),
        out_shape=jax.ShapeDtypeStruct((B, n_pad), jnp.float32),
        grid=(1,),                                   # whole batch in one step
        in_specs=[full(x), full(w1), full(w2), full(b2)],
        out_specs=pl.BlockSpec((B, n_pad), lambda i: (0, 0)),
        compiler_params=pltpu.CompilerParams(
            dimension_semantics=("arbitrary",)),      # no megacore split: 1 tiny step
        cost_estimate=cost,
    )(x, w1, w2, b2)

    return out[:, :classes]                           # drop padded lanes (exactly 0)


# ----------------------------------------------------------------------------- params
def init_params(key, F, dense, classes):
    """PyTorch-default-style uniform init; weights stored transposed (in, out)."""
    ks = jax.random.split(key, 8)

    def u(k, shape, fan_in):
        b = 1.0 / math.sqrt(fan_in)
        return jax.random.uniform(k, shape, jnp.float32, -b, b)

    # nn.Linear(2F, dense): stored (2F, dense), pre-split into GAP / GVP halves
    c_w = u(ks[0], (2 * F, dense), 2 * F)
    return {
        "cw_gap": c_w[:F],
        "cw_gvp": c_w[F:],
        "c_b": u(ks[1], (1, dense), 2 * F),
        # nn.Conv1d(F, dense, 1) == Linear(F, dense); weight stored (F, dense)
        "gap_w": u(ks[2], (F, dense), F),
        "gap_b": u(ks[3], (1, dense), F),
        "gvp_w": u(ks[4], (F, dense), F),   # unused downstream (kept for parity)
        "gvp_b": u(ks[5], (1, dense), F),   # unused downstream (kept for parity)
        # fullconnect: Dropout(0.5) + Linear(dense, classes)
        "lin_w": u(ks[6], (dense, classes), dense),
        "lin_b": u(ks[7], (1, classes), dense),
    }


def pack_params(p, F, dense, classes):
    """Wrapper-side packing into 3 kernel weight slabs (done once, outside the kernel)."""
    # First-stage fused slab:  [x_gap x_gvp 1 0] @ [[cw_gap gap_w],[cw_gvp 0],[c_b gap_b],[0 0]]
    k_pad = _round_up(2 * F + 1, 8)
    w1 = jnp.zeros((k_pad, 2 * dense), jnp.float32)
    w1 = w1.at[:F, :dense].set(p["cw_gap"])
    w1 = w1.at[F:2 * F, :dense].set(p["cw_gvp"])
    w1 = w1.at[:F, dense:].set(p["gap_w"])
    w1 = w1.at[2 * F, :dense].set(p["c_b"][0])
    w1 = w1.at[2 * F, dense:].set(p["gap_b"][0])

    # Head Linear padded to a lane-dense 128-wide output; pad bias lanes = -1e30
    # so the padded softmax lanes are exactly 0.
    n_pad = max(128, _round_up(classes, 128))
    w2 = jnp.zeros((dense, n_pad), jnp.float32).at[:, :classes].set(p["lin_w"])
    b2 = jnp.full((1, n_pad), -1e30, jnp.float32).at[:, :classes].set(p["lin_b"])
    return {"w1": w1, "w2": w2, "b2": b2}


# ----------------------------------------------------------------------------- main
if __name__ == "__main__":
    param = (8, 8, 16)                 # param[0] + param[1] + param[2] = 32 features
    F = int(sum(param))
    dense = 32
    classes = 5
    B = 16                             # whole batch processed in one grid step

    key = jax.random.PRNGKey(0)
    kg, kv, kp = jax.random.split(key, 3)
    f_gap = jax.random.normal(kg, (B, F), jnp.float32)
    f_gvp = jax.random.normal(kv, (B, F), jnp.float32)

    raw = init_params(kp, F, dense, classes)
    packed = pack_params(raw, F, dense, classes)

    fwd = jax.jit(functools.partial(statistician_forward, classes=classes))
    out = jax.block_until_ready(fwd(f_gap, f_gvp, packed))

    assert out.shape == (B, classes), out.shape
    assert bool(jnp.all(jnp.isfinite(out)))
    assert bool(jnp.allclose(jnp.sum(out, axis=-1), 1.0, atol=1e-5))
    print("KERNEL_OK")
</pallas_src>

<mosaic_0001>
module attributes {stable_mosaic.version = 11 : i64} {
  func.func @statistician_kernel(%arg0: i32, %arg1: memref<16x72xf32, #tpu.memory_space<vmem>>, %arg2: memref<72x64xf32, #tpu.memory_space<vmem>>, %arg3: memref<32x128xf32, #tpu.memory_space<vmem>>, %arg4: memref<1x128xf32, #tpu.memory_space<vmem>>, %arg5: memref<16x128xf32, #tpu.memory_space<vmem>>) attributes {dimension_semantics = [#tpu.dimension_semantics<arbitrary>], iteration_bounds = array<i64: 1>, scalar_prefetch = 0 : i64, scratch_operands = 0 : i64, tpu.core_type = #tpu.core_type<tc>, window_params = [{pipeline_mode = #tpu.pipeline_mode<synchronous>, transform_indices = @transform_0, window_bounds = array<i64: 16, 72>}, {pipeline_mode = #tpu.pipeline_mode<synchronous>, transform_indices = @transform_1, window_bounds = array<i64: 72, 64>}, {pipeline_mode = #tpu.pipeline_mode<synchronous>, transform_indices = @transform_2, window_bounds = array<i64: 32, 128>}, {pipeline_mode = #tpu.pipeline_mode<synchronous>, transform_indices = @transform_3, window_bounds = array<i64: 1, 128>}, {pipeline_mode = #tpu.pipeline_mode<synchronous>, transform_indices = @transform_4, window_bounds = array<i64: 16, 128>}]} {
    %c0 = arith.constant 0 : index
    %c0_0 = arith.constant 0 : index
    %0 = vector.load %arg1[%c0, %c0_0] : memref<16x72xf32, #tpu.memory_space<vmem>>, vector<16x72xf32>
    %c0_1 = arith.constant 0 : index
    %c0_2 = arith.constant 0 : index
    %1 = vector.load %arg2[%c0_1, %c0_2] : memref<72x64xf32, #tpu.memory_space<vmem>>, vector<72x64xf32>
    %cst = arith.constant dense<0.000000e+00> : vector<16x64xf32>
    %2 = tpu.matmul %0, %1, %cst {dimension_numbers = #tpu.dot_dimension_numbers<[1], [0], [0], [1], [0, 0, 1, 1], [], []>} : vector<16x72xf32>, vector<72x64xf32>, vector<16x64xf32> -> vector<16x64xf32>
    %3 = vector.extract_strided_slice %2 {offsets = [0, 0], sizes = [16, 32], strides = [1, 1]} : vector<16x64xf32> to vector<16x32xf32>
    %4 = vector.extract_strided_slice %2 {offsets = [0, 32], sizes = [16, 32], strides = [1, 1]} : vector<16x64xf32> to vector<16x32xf32>
    %cst_3 = arith.constant dense<0xFF800000> : vector<16xf32>
    %5 = vector.multi_reduction <maximumf>, %3, %cst_3 [1] : vector<16x32xf32> to vector<16xf32>
    %6 = vector.shape_cast %5 : vector<16xf32> to vector<16x1xf32>
    %7 = vector.broadcast %6 : vector<16x1xf32> to vector<16x32xf32>
    %8 = arith.subf %3, %7 : vector<16x32xf32>
    %9 = math.exp %8 : vector<16x32xf32>
    %cst_4 = arith.constant dense<0.000000e+00> : vector<16xf32>
    %10 = vector.multi_reduction <add>, %9, %cst_4 [1] : vector<16x32xf32> to vector<16xf32>
    %11 = vector.shape_cast %10 : vector<16xf32> to vector<16x1xf32>
    %12 = vector.broadcast %11 : vector<16x1xf32> to vector<16x32xf32>
    %13 = arith.divf %9, %12 : vector<16x32xf32>
    %14 = arith.mulf %13, %4 : vector<16x32xf32>
    %cst_5 = arith.constant dense<0.000000e+00> : vector<16xf32>
    %15 = vector.multi_reduction <add>, %14, %cst_5 [1] : vector<16x32xf32> to vector<16xf32>
    %16 = vector.shape_cast %15 : vector<16xf32> to vector<16x1xf32>
    %17 = vector.broadcast %16 : vector<16x1xf32> to vector<16x32xf32>
    %18 = arith.subf %4, %17 : vector<16x32xf32>
    %19 = vector.broadcast %16 : vector<16x1xf32> to vector<16x32xf32>
    %20 = arith.divf %18, %19 : vector<16x32xf32>
    %c0_6 = arith.constant 0 : index
    %c0_7 = arith.constant 0 : index
    %21 = vector.load %arg3[%c0_6, %c0_7] : memref<32x128xf32, #tpu.memory_space<vmem>>, vector<32x128xf32>
    %cst_8 = arith.constant dense<0.000000e+00> : vector<16x128xf32>
    %22 = tpu.matmul %20, %21, %cst_8 {dimension_numbers = #tpu.dot_dimension_numbers<[1], [0], [0], [1], [0, 0, 1, 1], [], []>} : vector<16x32xf32>, vector<32x128xf32>, vector<16x128xf32> -> vector<16x128xf32>
    %c0_9 = arith.constant 0 : index
    %c0_10 = arith.constant 0 : index
    %23 = vector.load %arg4[%c0_9, %c0_10] : memref<1x128xf32, #tpu.memory_space<vmem>>, vector<1x128xf32>
    %24 = vector.broadcast %23 : vector<1x128xf32> to vector<16x128xf32>
    %25 = arith.addf %22, %24 : vector<16x128xf32>
    %cst_11 = arith.constant dense<0xFF800000> : vector<16xf32>
    %26 = vector.multi_reduction <maximumf>, %25, %cst_11 [1] : vector<16x128xf32> to vector<16xf32>
    %27 = vector.shape_cast %26 : vector<16xf32> to vector<16x1xf32>
    %28 = vector.broadcast %27 : vector<16x1xf32> to vector<16x128xf32>
    %29 = arith.subf %25, %28 : vector<16x128xf32>
    %30 = math.exp %29 : vector<16x128xf32>
    %cst_12 = arith.constant dense<0.000000e+00> : vector<16xf32>
    %31 = vector.multi_reduction <add>, %30, %cst_12 [1] : vector<16x128xf32> to vector<16xf32>
    %32 = vector.shape_cast %31 : vector<16xf32> to vector<16x1xf32>
    %33 = vector.broadcast %32 : vector<16x1xf32> to vector<16x128xf32>
    %34 = arith.divf %30, %33 : vector<16x128xf32>
    %c0_13 = arith.constant 0 : index
    %c0_14 = arith.constant 0 : index
    %35 = vector.load %arg5[%c0_13, %c0_14] : memref<16x128xf32, #tpu.memory_space<vmem>>, vector<16x128xf32>
    tpu.vector_store %arg5[%c0_13, %c0_14], %34 {strides = array<i32>} : memref<16x128xf32, #tpu.memory_space<vmem>>, vector<16x128xf32>,
    return
  }
  func.func @transform_0(%arg0: i32) -> (i32, i32) {
    %c0_i32 = arith.constant 0 : i32
    %c0_i32_0 = arith.constant 0 : i32
    %c0_i32_1 = arith.constant 0 : i32
    return %c0_i32, %c0_i32_0 : i32, i32
  }
  func.func @transform_1(%arg0: i32) -> (i32, i32) {
    %c0_i32 = arith.constant 0 : i32
    %c0_i32_0 = arith.constant 0 : i32
    %c0_i32_1 = arith.constant 0 : i32
    return %c0_i32, %c0_i32_0 : i32, i32
  }
  func.func @transform_2(%arg0: i32) -> (i32, i32) {
    %c0_i32 = arith.constant 0 : i32
    %c0_i32_0 = arith.constant 0 : i32
    %c0_i32_1 = arith.constant 0 : i32
    return %c0_i32, %c0_i32_0 : i32, i32
  }
  func.func @transform_3(%arg0: i32) -> (i32, i32) {
    %c0_i32 = arith.constant 0 : i32
    %c0_i32_0 = arith.constant 0 : i32
    %c0_i32_1 = arith.constant 0 : i32
    return %c0_i32, %c0_i32_0 : i32, i32
  }
  func.func @transform_4(%arg0: i32) -> (i32, i32) {
    %c0_i32 = arith.constant 0 : i32
    %c0_i32_0 = arith.constant 0 : i32
    %c0_i32_1 = arith.constant 0 : i32
    return %c0_i32, %c0_i32_0 : i32, i32
  }
}

</mosaic_0001>

<bundles_post_ra>
// kernel: statistician_forward.1
= control target key start
LH: loop header
LB: loop body
LE: loop exit
PB: predicated region body
PF: predicated region fallthrough
CT: control target
= control target key end

     0   :  { %vm28_vm0 = vcmask 588800   ;;  %vm110_vm1 = vcmask 261120   ;;  %s450_s1 = inlined_call_operand.vmem [shape: f32[72,64], index: 1, kind: input, shape index: {}]   ;;  %s451_s0 = inlined_call_operand.vmem [shape: f32[16,72], index: 0, kind: input, shape index: {}]   ;;  %s452_s2 = inlined_call_operand.vmem [shape: f32[32,128], index: 2, kind: input, shape index: {}]   ;;  %s453_s3 = inlined_call_operand.vmem [shape: f32[1,128], index: 3, kind: input, shape index: {}]   ;;  %s454_s4 = inlined_call_operand.vmem [shape: f32[16,128], index: 4, kind: output, shape index: {}]  }
   0x1   :  { %v27_v0 = vld [vmem:[%s450_s1 + $0x40] sm:$0xff]  ;;  %v26_v1 = vld [vmem:[%s450_s1 + $0x38] sm:$0xff]  ;;  %v25_v2 = vld [vmem:[%s450_s1 + $0x30] sm:$0xff] }
   0x2   :  { %297 = vmatprep.subr.mxu0 %v27_v0  ;;  %v17_v3 = vld [vmem:[%s451_s0] sm:$0xff]  ;;  %v24_v4 = vld [vmem:[%s450_s1 + $0x28] sm:$0xff]  ;;  %v22_v6 = vld [vmem:[%s450_s1 + $0x18] sm:$0xff] }
   0x3   :  { %298 = vmatpush3.msra.mxu0 %v27_v0  ;;  %315 = vmatprep.mubr.msk.f32.mxu0 %vm28_vm0, %v17_v3  ;;  %v23_v5 = vld [vmem:[%s450_s1 + $0x20] sm:$0xff]  ;;  %v21_v7 = vld [vmem:[%s450_s1 + $0x10] sm:$0xff]  ;;  %v20_v8 = vld [vmem:[%s450_s1 + $0x8] sm:$0xff] }
   0x4   :  { %299 = vmatprep.subr.mxu0 %v26_v1  ;;  %v19_v9 = vld [vmem:[%s450_s1] sm:$0xff]  ;;  %v18_v10 = vld [vmem:[%s451_s0 + $0x8] sm:$0xff]  ;;  %s350_s1 = smov 96   ;;  %v158_v37 = vld [vmem:[%s452_s2 + $0x18] sm:$0xff] }
   0x5   :  { %300 = vmatpush3.msra.mxu0 %v26_v1  ;;  %v157_v38 = vld [vmem:[%s452_s2 + $0x10] sm:$0xff]  ;;  %318 = vmatprep.subr.mxu1 %v158_v37  ;;  %v156_v40 = vld [vmem:[%s452_s2 + $0x8] sm:$0xff]  ;;  %v155_v41 = vld [vmem:[%s452_s2] sm:$0xff] }
   0x6   :  { %301 = vmatprep.subr.mxu0 %v25_v2  ;;  %319 = vmatpush3.msra.mxu1 %v158_v37  ;;  %v277_v51 = vld [vmem:[%s453_s3] ss:$0 sm:$0xff] }
   0x7   :  { %302 = vmatpush3.msra.mxu0 %v25_v2  ;;  %320 = vmatprep.subr.mxu1 %v157_v38 }
   0x8   :  { %303 = vmatprep.subr.mxu0 %v24_v4  ;;  %321 = vmatpush3.msra.mxu1 %v157_v38 }
   0x9   :  { %304 = vmatpush3.msra.mxu0 %v24_v4  ;;  %322 = vmatprep.subr.mxu1 %v156_v40 }
   0xa   :  { %305 = vmatprep.subr.mxu0 %v23_v5  ;;  %323 = vmatpush3.msra.mxu1 %v156_v40 }
   0xb   :  { %306 = vmatpush3.msra.mxu0 %v23_v5  ;;  %324 = vmatprep.subr.mxu1 %v155_v41 }
   0xc   :  { %307 = vmatprep.subr.mxu0 %v22_v6  ;;  %325 = vmatpush3.msra.mxu1 %v155_v41 }
   0xd   :  { %308 = vmatpush3.msra.mxu0 %v22_v6 }
   0xe   :  { %309 = vmatprep.subr.mxu0 %v21_v7 }
   0xf   :  { %310 = vmatpush3.msra.mxu0 %v21_v7 }
  0x10   :  { %311 = vmatprep.subr.mxu0 %v20_v8 }
  0x11   :  { %312 = vmatpush3.msra.mxu0 %v20_v8 }
  0x12   :  { %313 = vmatprep.subr.mxu0 %v19_v9 }
  0x13   :  { %314 = vmatpush3.msra.mxu0 %v19_v9 }
  0x14   :  { %316 = vmatmul.mubr.msk.f32.vlgmr.msra.gmra.mxu0 %vm28_vm0, %v18_v10 }
  0xd4   :  { %v317_v11 = vpop.f32.mrf.mxu0 }
  0xd5   :  { %v114_v14 = vsel %vm110_vm1, %v317_v11, -inf }
  0xd6   :  { %v411_v12 = vpop.f32.mrf.mxu0 }
  0xd7   :  { %v111_v13 = vsel %vm110_vm1, %v411_v12, -inf }
  0xd8   :  { %112 = vmax.xlane.f32.xlu0 %v111_v13 }
  0xdc   :  { %115 = vmax.xlane.f32.xlu0 %v114_v14 }
  0xf2   :  { %135 = vrot.lane.b32.xlu0 %v411_v12, %s350_s1 }
 0x161   :  { %v113_v15 = vpop.xlane.xlu0 %112 }
 0x162   :  { %v117_v16 = vsub.f32 %v411_v12, %v113_v15 }
 0x164   :  { %v119_v19 = vmul.f32 1.442695, %v117_v16 }
 0x165   :  { %v116_v17 = vpop.xlane.xlu0 %115 }
 0x166   :  { %v118_v18 = vsub.f32 %v317_v11, %v116_v17 }
 0x168   :  { %v121_v20 = vmul.f32 1.442695, %v118_v18 }
 0x169   :  { %v136_v34 = vpop.permute.xlu0 %135 }
 0x16a   :  { %330 = vpow2.f32 %v121_v20 }
 0x16b   :  { %332 = vpow2.f32 %v119_v19 }
 0x177   :  { %v331_v21 = vpop.eup %330 }
 0x178   :  { %v126_v22 = vsel %vm110_vm1, %v331_v21, 0.0  ;;  %v333_v23 = vpop.eup %332 }
 0x179   :  { %127 = vadd.xlane.f32.xlu1 %v126_v22  ;;  %v123_v24 = vsel %vm110_vm1, %v333_v23, 0.0 }
 0x17d   :  { %124 = vadd.xlane.f32.xlu1 %v123_v24 }
 0x18e   :  { %137 = vrot.lane.b32.xlu1 %v317_v11, %s350_s1 }
 0x202   :  { %v128_v25 = vpop.xlane.xlu1 %127 }
 0x203   :  { %334 = vrcp.f32 %v128_v25 }
 0x206   :  { %v125_v26 = vpop.xlane.xlu1 %124 }
 0x207   :  { %336 = vrcp.f32 %v125_v26 }
 0x20a   :  { %v138_v29 = vpop.permute.xlu1 %137 }
 0x210   :  { %v335_v27 = vpop.eup %334 }
 0x211   :  { %v132_v28 = vmul.f32 %v335_v27, %v331_v21 }
 0x213   :  { %v142_v30 = vmul.f32 %v138_v29, %v132_v28 }
 0x214   :  { %v337_v31 = vpop.eup %336 }
 0x215   :  { %v146_v32 = vsel %vm110_vm1, %v142_v30, 0.0  ;;  %v130_v33 = vmul.f32 %v337_v31, %v333_v23 }
 0x216   :  { %147 = vadd.xlane.f32.xlu0 %v146_v32 }
 0x217   :  { %v141_v35 = vmul.f32 %v136_v34, %v130_v33 }
 0x219   :  { %v143_v36 = vsel %vm110_vm1, %v141_v35, 0.0 }
 0x21a   :  { %144 = vadd.xlane.f32.xlu1 %v143_v36 }
 0x29f   :  { %v148_v39 = vpop.xlane.xlu0 %147 }
 0x2a0   :  { %338 = vrcp.f32 %v148_v39  ;;  %v150_v43 = vsub.f32 %v317_v11, %v148_v39 }
 0x2a3   :  { %v145_v42 = vpop.xlane.xlu1 %144 }
 0x2a4   :  { %340 = vrcp.f32 %v145_v42  ;;  %v149_v46 = vsub.f32 %v411_v12, %v145_v42 }
 0x2ad   :  { %v339_v44 = vpop.eup %338 }
 0x2ae   :  { %v154_v45 = vmul.f32 %v339_v44, %v150_v43 }
 0x2b0   :  { %170 = vrot.lane.b32.xlu1 %v154_v45, %s350_s1 }
 0x2b1   :  { %v341_v47 = vpop.eup %340 }
 0x2b2   :  { %v152_v48 = vmul.f32 %v341_v47, %v149_v46 }
 0x2b4   :  { %168 = vrot.lane.b32.xlu0 %v152_v48, %s350_s1 }
 0x322   :  { %v171_v50 = vpop.permute.xlu1 %170 }
 0x326   :  { %v169_v49 = vpop.permute.xlu0 %168 }
 0x327   :  { %326 = vmatprep.mubr.msk.f32.mxu1 %vm110_vm1, %v169_v49 }
 0x328   :  { %327 = vmatmul.mubr.msk.f32.vlgmr.msra.gmra.mxu1 %vm110_vm1, %v171_v50 }
 0x3e8   :  { %v328_v52 = vpop.f32.mrf.mxu1 }
 0x3e9   :  { %v248_v53 = vadd.f32 %v328_v52, %v277_v51 }
 0x3ea   :  { %v242_v54 = vpop.f32.mrf.mxu1 }
 0x3eb   :  { %v243_v55 = vadd.f32 %v277_v51, %v242_v54  ;;  %253 = vmax.xlane.f32.xlu0 %v248_v53 }
 0x3ed   :  { %251 = vmax.xlane.f32.xlu1 %v243_v55 }
 0x474   :  { %v254_v56 = vpop.xlane.xlu0 %253 }
 0x475   :  { %v256_v57 = vsub.f32 %v248_v53, %v254_v56 }
 0x476   :  { %v252_v58 = vpop.xlane.xlu1 %251 }
 0x477   :  { %v259_v59 = vmul.f32 1.442695, %v256_v57  ;;  %v255_v60 = vsub.f32 %v243_v55, %v252_v58 }
 0x479   :  { %342 = vpow2.f32 %v259_v59  ;;  %v257_v61 = vmul.f32 1.442695, %v255_v60 }
 0x47b   :  { %344 = vpow2.f32 %v257_v61 }
 0x486   :  { %v343_v62 = vpop.eup %342 }
 0x487   :  { %263 = vadd.xlane.f32.xlu1 %v343_v62 }
 0x488   :  { %v345_v63 = vpop.eup %344 }
 0x489   :  { %261 = vadd.xlane.f32.xlu0 %v345_v63 }
 0x510   :  { %v264_v0 = vpop.xlane.xlu1 %263 }
 0x511   :  { %346 = vrcp.f32 %v264_v0 }
 0x512   :  { %v262_v1 = vpop.xlane.xlu0 %261 }
 0x513   :  { %348 = vrcp.f32 %v262_v1 }
 0x51e   :  { %v347_v2 = vpop.eup %346 }
 0x51f   :  { %v268_v3 = vmul.f32 %v347_v2, %v343_v62 }
 0x520   :  { %v349_v4 = vpop.eup %348 }
 0x521   :  { %270 = vst [vmem:[%s454_s4 + $0x8] sm:$0xff] %v268_v3  ;;  %v266_v5 = vmul.f32 %v349_v4, %v345_v63 }
 0x523   :  { %269 = vst [vmem:[%s454_s4] sm:$0xff] %v266_v5 }

</bundles_post_ra>
